<compile_context>
chip_gen: v7x
topology: tpu7x:2x2x1
jax: 0.10.0
libtpu: 0.0.40
codegen_flags: <defaults>
</compile_context>

<pallas_src>
import jax
import jax.numpy as jnp
from jax.experimental import pallas as pl
from jax.experimental.pallas import tpu as pltpu


def _tile(dim, pref):
    """Pick a tile size <= pref that divides dim (fallback: full dim)."""
    t = min(dim, pref)
    return t if dim % t == 0 else dim
    # TODO(synk): pad to tile multiples for production shapes instead of
    # falling back to the full dimension.


# ---------------------- embedding gather + ReLU (dropout=id) ----------------
def _embed_gather_kernel(ids_ref, table_ref, o_ref):
    # table_ref is the single (1, 1, E) row selected by the ids-driven
    # index_map.  ReLU fused here; dropout is eval-mode identity.
    del ids_ref
    o_ref[...] = jnp.maximum(table_ref[...], 0).astype(o_ref.dtype)


def embed_relu_gather(input_seq, emb_table):
    """Row gather of emb_table at input_seq ids, fused ReLU. -> (T*B, E) bf16."""
    T, B = input_seq.shape
    V, E = emb_table.shape
    N = T * B
    ids = input_seq.reshape(-1).astype(jnp.int32)
    table3 = emb_table.reshape(V, 1, E)  # keep last-two block dims == full dims
    out = pl.pallas_call(
        _embed_gather_kernel,
        out_shape=jax.ShapeDtypeStruct((N, 1, E), emb_table.dtype),
        grid_spec=pltpu.PrefetchScalarGridSpec(
            num_scalar_prefetch=1,                       # ids -> SMEM
            grid=(N,),
            in_specs=[
                # data-dependent row select: block row = ids[i]
                pl.BlockSpec((1, 1, E), lambda i, ids_ref: (ids_ref[i], 0, 0)),
            ],
            out_specs=pl.BlockSpec((1, 1, E), lambda i, ids_ref: (i, 0, 0)),
        ),
        compiler_params=pltpu.CompilerParams(
            dimension_semantics=("arbitrary",)),
    )(ids, table3)
    return out.reshape(N, E)


# -------------------------- tiled matmul + bias ------------------------------
def _matmul_bias_kernel(a_ref, b_ref, bias_ref, o_ref, acc_ref):
    k = pl.program_id(2)

    @pl.when(k == 0)
    def _():
        acc_ref[...] = jnp.zeros_like(acc_ref)

    a = a_ref[...]
    if a.dtype != jnp.bfloat16:          # static (trace-time) dtype check
        a = a.astype(jnp.bfloat16)
    acc_ref[...] += jnp.dot(a, b_ref[...], preferred_element_type=jnp.float32)

    @pl.when(k == pl.num_programs(2) - 1)
    def _():
        o_ref[...] = (acc_ref[...] + bias_ref[...]).astype(o_ref.dtype)


def matmul_bias(a, w, bias, *, tm=256, tn=512, tk=512):
    """(M,K) @ (K,N) + bias(1,N) -> (M,N) f32.  bf16 MXU, f32 accumulate.

    Default tile sizes are sized for v7x's 64 MiB VMEM (bf16 weight tile
    512x512 = 0.5 MiB, double-buffered).  On v6e/v5e larger tn/tk are fine.
    """
    M, K = a.shape
    _, N = w.shape
    tm, tn, tk = _tile(M, tm), _tile(N, tn), _tile(K, tk)
    return pl.pallas_call(
        _matmul_bias_kernel,
        out_shape=jax.ShapeDtypeStruct((M, N), jnp.float32),
        grid_spec=pltpu.PrefetchScalarGridSpec(
            num_scalar_prefetch=0,
            grid=(M // tm, N // tn, K // tk),
            in_specs=[
                pl.BlockSpec((tm, tk), lambda i, j, k: (i, k)),
                pl.BlockSpec((tk, tn), lambda i, j, k: (k, j)),
                pl.BlockSpec((1, tn), lambda i, j, k: (0, j)),
            ],
            out_specs=pl.BlockSpec((tm, tn), lambda i, j, k: (i, j)),
            scratch_shapes=[pltpu.VMEM((tm, tn), jnp.float32)],
        ),
        compiler_params=pltpu.CompilerParams(
            dimension_semantics=("parallel", "parallel", "arbitrary")),
    )(a, w, bias)


# --------------------------------- LSTM --------------------------------------
def _lstm_kernel(xp_ref, whh_ref, h0_ref, c0_ref,
                 out_ref, hN_ref, cN_ref, h_sc, c_sc):
    s = pl.program_id(0)
    H = h_sc.shape[-1]
    Tc = xp_ref.shape[0]

    @pl.when(s == 0)
    def _():
        h_sc[...] = h0_ref[...]
        c_sc[...] = c0_ref[...]

    def step(t, carry):
        h, c = carry
        # x @ W_ih + b was precomputed (hoisted off the serial path);
        # only the recurrent matmul remains per timestep.
        gates = xp_ref[t] + jnp.dot(h.astype(jnp.bfloat16), whh_ref[...],
                                    preferred_element_type=jnp.float32)
        # PyTorch LSTM gate order: i, f, g, o.  H % 128 == 0 -> lane-aligned.
        i = jax.nn.sigmoid(gates[:, 0 * H:1 * H])
        f = jax.nn.sigmoid(gates[:, 1 * H:2 * H])
        g = jnp.tanh(gates[:, 2 * H:3 * H])
        o = jax.nn.sigmoid(gates[:, 3 * H:4 * H])
        c = f * c + i * g
        h = o * jnp.tanh(c)
        out_ref[t] = h
        return (h, c)

    h, c = jax.lax.fori_loop(0, Tc, step, (h_sc[...], c_sc[...]), unroll=True)
    h_sc[...] = h
    c_sc[...] = c

    @pl.when(s == pl.num_programs(0) - 1)
    def _():
        hN_ref[...] = h
        cN_ref[...] = c


def lstm_recurrence(x_proj, w_hh, h0, c0, *, time_chunk=8):
    """Run the LSTM recurrence over precomputed gate pre-activations x_proj."""
    T, B, _ = x_proj.shape
    H = h0.shape[-1]
    Tc = _tile(T, time_chunk)        # amortize per-grid-step overhead
    outputs, hN, cN = pl.pallas_call(
        _lstm_kernel,
        out_shape=(
            jax.ShapeDtypeStruct((T, B, H), jnp.float32),
            jax.ShapeDtypeStruct((B, H), jnp.float32),
            jax.ShapeDtypeStruct((B, H), jnp.float32),
        ),
        grid_spec=pltpu.PrefetchScalarGridSpec(
            num_scalar_prefetch=0,
            grid=(T // Tc,),
            in_specs=[
                pl.BlockSpec((Tc, B, 4 * H), lambda s: (s, 0, 0)),
                # time-invariant operands; on v7x consider
                # pipeline_mode=pl.Buffered(1) to avoid double-buffering w_hh.
                pl.BlockSpec((H, 4 * H), lambda s: (0, 0)),
                pl.BlockSpec((B, H), lambda s: (0, 0)),
                pl.BlockSpec((B, H), lambda s: (0, 0)),
            ],
            out_specs=(
                pl.BlockSpec((Tc, B, H), lambda s: (s, 0, 0)),
                pl.BlockSpec((B, H), lambda s: (0, 0)),
                pl.BlockSpec((B, H), lambda s: (0, 0)),
            ),
            scratch_shapes=[
                pltpu.VMEM((B, H), jnp.float32),
                pltpu.VMEM((B, H), jnp.float32),
            ],
        ),
        compiler_params=pltpu.CompilerParams(
            dimension_semantics=("arbitrary",)),   # recurrent axis
        # TODO(synk): for large B on v7x, add a leading "parallel" batch-split
        # grid axis so both TensorCores run half the batch of the recurrence.
    )(x_proj, w_hh, h0, c0)
    return outputs, hN, cN


# ------------------------------ module wrapper --------------------------------
class DecoderBase:
    def __init__(self, output_dim, embed_dim, hidden_dim, dropout, key):
        self.output_dim = output_dim
        self.embed_dim = embed_dim
        self.hidden_dim = hidden_dim
        self.dropout_p = dropout  # eval-mode identity
        ks = jax.random.split(key, 6)
        s = 0.1
        # nn.Embedding(output_dim, embed_dim)  (bf16 storage)
        self.emb = (s * jax.random.normal(ks[0], (output_dim, embed_dim),
                                          jnp.float32)).astype(jnp.bfloat16)
        # self.network := single-layer LSTM(embed_dim -> hidden_dim)
        self.w_ih = (s * jax.random.normal(ks[1], (embed_dim, 4 * hidden_dim),
                                           jnp.float32)).astype(jnp.bfloat16)
        self.w_hh = (s * jax.random.normal(ks[2], (hidden_dim, 4 * hidden_dim),
                                           jnp.float32)).astype(jnp.bfloat16)
        # single fused bias (== PyTorch b_ih + b_hh), kept f32
        self.b_lstm = (s * jax.random.normal(ks[3], (4 * hidden_dim,),
                                             jnp.float32)).reshape(1, 4 * hidden_dim)
        # nn.Linear(hidden_dim, output_dim) — stored pre-transposed (H, V), bf16
        self.w_out = (s * jax.random.normal(ks[4], (hidden_dim, output_dim),
                                            jnp.float32)).astype(jnp.bfloat16)
        self.b_out = (s * jax.random.normal(ks[5], (output_dim,),
                                            jnp.float32)).reshape(1, output_dim)

    def __call__(self, input_seq, hidden, cell):
        T, B = input_seq.shape
        H = self.hidden_dim
        # embedded = dropout(relu(embedding(input_seq)))  (dropout = identity)
        rows = embed_relu_gather(input_seq, self.emb)            # (T*B, E) bf16
        # hoisted input projection: one big matmul instead of T small ones
        x_proj = matmul_bias(rows, self.w_ih, self.b_lstm)       # (T*B, 4H) f32
        x_proj = x_proj.reshape(T, B, 4 * H)
        if cell is not None:
            out, hN, cN = lstm_recurrence(x_proj, self.w_hh, hidden[0], cell[0])
            hidden, cell = hN[None], cN[None]                    # (1, B, H)
        else:
            # TODO(synk): base class leaves self.network abstract; GRU branch
            # (cell is None) is not instantiated here.
            raise NotImplementedError("GRU network path not instantiated")
        logits = matmul_bias(out.reshape(T * B, H), self.w_out, self.b_out)
        return logits.reshape(T, B, self.output_dim), hidden, cell


# ------------------------------ pure-JAX reference ----------------------------
def _reference(dec, input_seq, hidden, cell):
    T, B = input_seq.shape
    H = dec.hidden_dim
    ids = input_seq.reshape(-1)
    rows = jnp.maximum(dec.emb[ids], 0)                          # bf16
    xp = (jnp.dot(rows, dec.w_ih, preferred_element_type=jnp.float32)
          + dec.b_lstm).reshape(T, B, 4 * H)

    def step(carry, x):
        h, c = carry
        gates = x + jnp.dot(h.astype(jnp.bfloat16), dec.w_hh,
                            preferred_element_type=jnp.float32)
        i = jax.nn.sigmoid(gates[:, 0 * H:1 * H])
        f = jax.nn.sigmoid(gates[:, 1 * H:2 * H])
        g = jnp.tanh(gates[:, 2 * H:3 * H])
        o = jax.nn.sigmoid(gates[:, 3 * H:4 * H])
        c = f * c + i * g
        h = o * jnp.tanh(c)
        return (h, c), h

    (hN, cN), outs = jax.lax.scan(step, (hidden[0], cell[0]), xp)
    logits = (jnp.dot(outs.reshape(T * B, H).astype(jnp.bfloat16), dec.w_out,
                      preferred_element_type=jnp.float32) + dec.b_out)
    return logits.reshape(T, B, -1), hN[None], cN[None]


if __name__ == "__main__":
    # small, TPU-aligned shapes: vocab=256, embed=128, hidden=128, seq=8, batch=8
    V, E, H, T, B = 256, 128, 128, 8, 8
    key = jax.random.PRNGKey(0)
    k_param, k_seq, k_h, k_c = jax.random.split(key, 4)

    dec = DecoderBase(output_dim=V, embed_dim=E, hidden_dim=H, dropout=0.1,
                      key=k_param)

    input_seq = jax.random.randint(k_seq, (T, B), 0, V, dtype=jnp.int32)
    hidden = jax.random.normal(k_h, (1, B, H), jnp.float32)
    cell = jax.random.normal(k_c, (1, B, H), jnp.float32)

    logits, h_out, c_out = dec(input_seq, hidden, cell)
    jax.block_until_ready((logits, h_out, c_out))

    ref_logits, ref_h, ref_c = _reference(dec, input_seq, hidden, cell)
    assert logits.shape == (T, B, V)
    assert h_out.shape == (1, B, H) and c_out.shape == (1, B, H)
    assert jnp.allclose(logits, ref_logits, atol=2e-3, rtol=2e-3)
    assert jnp.allclose(h_out, ref_h, atol=2e-3, rtol=2e-3)
    assert jnp.allclose(c_out, ref_c, atol=2e-3, rtol=2e-3)

    print("KERNEL_OK")
</pallas_src>

<mosaic_0001>
module attributes {stable_mosaic.version = 11 : i64} {
  func.func @_embed_gather_kernel(%arg0: i32, %arg1: memref<64xi32, #tpu.memory_space<smem>>, %arg2: memref<1x1x128xbf16, #tpu.memory_space<vmem>>, %arg3: memref<1x1x128xbf16, #tpu.memory_space<vmem>>) attributes {dimension_semantics = [#tpu.dimension_semantics<arbitrary>], iteration_bounds = array<i64: 64>, scalar_prefetch = 1 : i64, scratch_operands = 0 : i64, tpu.core_type = #tpu.core_type<tc>, window_params = [{transform_indices = @transform_0, window_bounds = array<i64: 1, 1, 128>}, {transform_indices = @transform_1, window_bounds = array<i64: 1, 1, 128>}]} {
    %c0 = arith.constant 0 : index
    %c0_0 = arith.constant 0 : index
    %c0_1 = arith.constant 0 : index
    %0 = vector.load %arg2[%c0, %c0_0, %c0_1] : memref<1x1x128xbf16, #tpu.memory_space<vmem>>, vector<1x1x128xbf16>
    %cst = arith.constant 0.000000e+00 : bf16
    %1 = vector.broadcast %cst : bf16 to vector<1x1x128xbf16>
    %2 = arith.maximumf %0, %1 : vector<1x1x128xbf16>
    %c0_2 = arith.constant 0 : index
    %c0_3 = arith.constant 0 : index
    %c0_4 = arith.constant 0 : index
    %3 = vector.load %arg3[%c0_2, %c0_3, %c0_4] : memref<1x1x128xbf16, #tpu.memory_space<vmem>>, vector<1x1x128xbf16>
    tpu.vector_store %arg3[%c0_2, %c0_3, %c0_4], %2 {strides = array<i32>} : memref<1x1x128xbf16, #tpu.memory_space<vmem>>, vector<1x1x128xbf16>,
    return
  }
  func.func @transform_0(%arg0: i32, %arg1: memref<64xi32, #tpu.memory_space<smem>>) -> (i32, i32, i32) {
    %0 = arith.index_cast %arg0 : i32 to index
    %1 = memref.load %arg1[%0] : memref<64xi32, #tpu.memory_space<smem>>
    %c0_i32 = arith.constant 0 : i32
    %c0_i32_0 = arith.constant 0 : i32
    %c0_i32_1 = arith.constant 0 : i32
    return %1, %c0_i32, %c0_i32_0 : i32, i32, i32
  }
  func.func @transform_1(%arg0: i32, %arg1: memref<64xi32, #tpu.memory_space<smem>>) -> (i32, i32, i32) {
    %c0_i32 = arith.constant 0 : i32
    %c0_i32_0 = arith.constant 0 : i32
    %c0_i32_1 = arith.constant 0 : i32
    return %arg0, %c0_i32, %c0_i32_0 : i32, i32, i32
  }
}

</mosaic_0001>

<bundles_post_ra>
// kernel: tpu_custom_call.1
= control target key start
LH: loop header
LB: loop body
LE: loop exit
PB: predicated region body
PF: predicated region fallthrough
CT: control target
= control target key end

     0   :  { %s239_s0 = inlined_call_operand.vmem [shape: s32[64], index: 0, kind: input, shape index: {}]   ;;  %s240_s1 = inlined_call_operand.vmem [shape: bf16[256,1,128], index: 1, kind: input, shape index: {}]   ;;  %s241_s2 = inlined_call_operand.vmem [shape: bf16[64,1,128], index: 2, kind: output, shape index: {}]  }
   0x1   :  { %s7_s11 = sshll.u32 %s239_s0, 4  ;;  %s8_s11 = int_to_ptr.vmem [resolvable:$true] %s7_s11 }
   0x2   :  { %s191_s12 = scalar_lea.vmem %s8_s11, 16  ;;  %p196_p1 = scmp.lt.s32.totalorder %s8_s11, %s8_s11 }
   0x3   :  { %p192_p0 = scmp.ne.s32.totalorder %s8_s11, %s191_s12  ;;  %p197_p2 = scmp.lt.s32.totalorder %s191_s12, %s191_s12 }
   0x5   :  { %p198_p3 = por %p197_p2, %p196_p1 }
   0x7   :  { %p199_p4 = pnand %p198_p3, %p192_p0 }
   0x9   :  { %202 = shalt.err (!%p199_p4)  }
   0xa   :  { %s213_s13 = smov [#allocation3]  }
   0xb   :  { %10 = dma.vmem_to_smem %s8_s11, 16, %s213_s13, [#allocation2] }
   0xc   :  { %207 = dma.done.wait [#allocation2], 16 }
   0xd   :  { %208 = vsyncadd [#allocation2], 4294967280 }
   0xe   :  { %12 = sfence }
   0xf   :  { %s209_s14 = smov 0  }
  0x10 LB: > { %s174_s15 = sadd.s32 4294967295, %s211_s14   ;;  %p178_p5 = scmp.ge.s32.totalorder %s211_s14, 1  ;;  %s211_s14 = sphi %s209_s14, %s18_s14  }
  0x11   : > { %p96_p6 = scmp.lt.s32.totalorder %s211_s14, 65 }
  0x13   : > { %p97_p7 = pnand %p178_p5, %p96_p6 }
  0x14   : > { %s113_s0 = sld [smem:[#allocation3 + %s174_s15]] (!%p97_p7)  ;;  %p118_p8 = scmp.lt.s32.totalorder (!%p97_p7), %s174_s15, 63  ;;  %vm124_vm0 = vcmask (!%p97_p7), 1040384   ;;  %vm125_vm1 = vsmask.f32 (!%p97_p7), 256  ;;  %v214_v2 = vmov (!%p97_p7), 0  }
  0x15   : > { %100 = sbr.rel (%p97_p7) target bundleno = 35 (0x23), region = 24  ;;  %vm126_vm2 = vmand (!%p97_p7), %vm124_vm0, %vm125_vm1 }
  0x1a   : > { %p114_p9 = scmp.lt.s32.totalorder (!%p97_p7), %s113_s0, 255 }
  0x1c   : > { %s243_s15 = smov (!%p118_p8, %s174_s15), 63  ;;  %s245_s0 = smov (!%p114_p9, %s113_s0), 255 }
  0x1d   : > { %s120_s18 = scalar_lea.vmem %s241_s2, %s243_s15  ;;  %s116_s21 = scalar_lea.vmem %s240_s1, %s245_s0 }
  0x1e   : > { %v122_v0 = vld [vmem:[%s116_s21] sm:$0x1] }
  0x1f   : > { %v127_v1 = vld [vmem:[%s120_s18] sm:$0x1]  ;;  %v123_v3 = vmax.bf16 %v214_v2, %v122_v0 }
  0x21   : > { %v128_v4 = vsel %vm126_vm2, %v123_v3, %v127_v1 }
  0x22   : > { %129 = vst [vmem:[%s120_s18] sm:$0x1] %v128_v4 }
  0x23 PF: > { %s18_s14 = sadd.s32 1, %s211_s14  }
  0x24   : > { %p15_p10 = scmp.ge.s32.totalorder %s18_s14, 66  }
  0x26   :  { %17 = sbr.rel (!%p15_p10) target bundleno = 16 (0x10), region = 54 }

</bundles_post_ra>
